<compile_context>
chip_gen: v7x
topology: tpu7x:2x2x1
jax: 0.10.0
libtpu: 0.0.40
codegen_flags: <defaults>
</compile_context>

<pallas_src>
import jax
import jax.numpy as jnp
from jax.experimental import pallas as pl
from jax.experimental.pallas import tpu as pltpu


def residual_block_kernel(xT_ref, uT_ref, w1xT_ref, w1uT_ref, b1_ref,
                          w2T_ref, b2_ref, o_ref):
    """Per batch-tile (batch in lanes):
         h^T  = relu(W1x^T @ x^T + W1u^T @ u^T + b1)
         y^T  = W2^T @ h^T + b2
         out^T = y^T + x^T          (exact f32 residual, lane-dense store)
    """
    xT = xT_ref[...]                                     # (Dx, TB) f32 residual

    # layer 1 (bf16 MXU inputs, f32 accumulation)
    h = jnp.dot(w1xT_ref[...], xT.astype(jnp.bfloat16),
                preferred_element_type=jnp.float32)      # (H, TB)
    h = h + jnp.dot(w1uT_ref[...], uT_ref[...].astype(jnp.bfloat16),
                    preferred_element_type=jnp.float32)
    h = jnp.maximum(h + b1_ref[...], 0.0)                # f32 bias + ReLU (v5e-safe)

    # layer 2 (single h->bf16 cast, f32 accumulation)
    y = jnp.dot(w2T_ref[...], h.astype(jnp.bfloat16),
                preferred_element_type=jnp.float32) + b2_ref[...]   # (Dx, TB)

    # ResidualBlock: op(X, U) + X   (exact f32 add, unmasked 128-lane store)
    o_ref[...] = (y + xT).astype(o_ref.dtype)


def _pick_tile_b(B, *, lane=128, min_steps=4, max_tile=8192):
    """Batch-tile (lane-dim) size: multiple of 128, sized so the grid has at
    least `min_steps` steps (>= 2 pipelined steps per v7x TensorCore), capped
    so double-buffered tiles stay well inside the scoped VMEM default."""
    if B < lane:
        return None                       # can't fill a lane; use XLA fallback
    n_blocks = pl.cdiv(B, lane)
    tb_blocks = max(1, min(n_blocks // min_steps, max_tile // lane))
    return tb_blocks * lane


def _reference_forward(X, U, params):
    """Pure-JAX path (also used as the correctness reference)."""
    W1x, W1u, b1, W2, b2 = params
    Xf = X[:, 0, :]
    h = jnp.maximum(Xf @ W1x + U @ W1u + b1, 0.0)
    y = h @ W2 + b2
    return y[:, None, :] + X


def residual_block_forward(X, U, params):
    """X: (B, 1, Dx), U: (B, Du) -> (B, 1, Dx)."""
    W1x, W1u, b1, W2, b2 = params
    B, one, Dx = X.shape
    assert one == 1
    Du = U.shape[1]
    H = W1x.shape[1]

    tile_b = _pick_tile_b(B)
    if tile_b is None:
        # Tiny batches: a 1-step pallas_call's launch overhead dominates.
        return _reference_forward(X, U, params)

    # Batch-in-lanes layout: batch is the 128-lane / MXU-N axis.
    B_pad = pl.cdiv(B, tile_b) * tile_b
    xT = X.reshape(B, Dx).astype(jnp.float32).T          # (Dx, B)
    uT = U.astype(jnp.float32).T                         # (Du, B)
    if B_pad != B:
        xT = jnp.pad(xT, ((0, 0), (0, B_pad - B)))
        uT = jnp.pad(uT, ((0, 0), (0, B_pad - B)))

    # Transposed weights: matmul operands bf16, biases f32.
    w1xT = W1x.T.astype(jnp.bfloat16)                    # (H, Dx)
    w1uT = W1u.T.astype(jnp.bfloat16)                    # (H, Du)
    b1c = b1.reshape(H, 1).astype(jnp.float32)           # (H, 1)
    w2T = W2.T.astype(jnp.bfloat16)                      # (Dx, H)
    b2c = b2.reshape(Dx, 1).astype(jnp.float32)          # (Dx, 1)

    grid = (B_pad // tile_b,)

    outT = pl.pallas_call(
        residual_block_kernel,
        out_shape=jax.ShapeDtypeStruct((Dx, B_pad), jnp.float32),
        grid_spec=pltpu.PrefetchScalarGridSpec(
            num_scalar_prefetch=0,
            grid=grid,
            in_specs=[
                pl.BlockSpec((Dx, tile_b), lambda i: (0, i)),   # x^T tile (f32)
                pl.BlockSpec((Du, tile_b), lambda i: (0, i)),   # u^T tile (f32)
                pl.BlockSpec((H, Dx), lambda i: (0, 0)),        # W1x^T (bf16)
                pl.BlockSpec((H, Du), lambda i: (0, 0)),        # W1u^T (bf16)
                pl.BlockSpec((H, 1), lambda i: (0, 0)),         # b1 (f32)
                pl.BlockSpec((Dx, H), lambda i: (0, 0)),        # W2^T (bf16)
                pl.BlockSpec((Dx, 1), lambda i: (0, 0)),        # b2 (f32)
            ],
            out_specs=pl.BlockSpec((Dx, tile_b), lambda i: (0, i)),
        ),
        compiler_params=pltpu.CompilerParams(
            dimension_semantics=("parallel",)),
    )(xT, uT, w1xT, w1uT, b1c, w2T, b2c)

    return outT[:, :B].T.reshape(B, 1, Dx).astype(X.dtype)


if __name__ == "__main__":
    key = jax.random.PRNGKey(0)
    # Small feature dims (typical dynamics-model sizes); batch sized so the
    # tile picker yields tile_b=128, grid=(4,) -> 2 pipelined steps per v7x core.
    B, Dx, Du, H = 512, 32, 8, 64

    k_x, k_u, k1, k2, k3, k4, k5 = jax.random.split(key, 7)

    # deterministic synthetic parameters (no checkpoint load)
    W1x = jax.random.normal(k1, (Dx, H), jnp.float32) * 0.1
    W1u = jax.random.normal(k2, (Du, H), jnp.float32) * 0.1
    b1 = jax.random.normal(k3, (H,), jnp.float32) * 0.01
    W2 = jax.random.normal(k4, (H, Dx), jnp.float32) * 0.1
    b2 = jax.random.normal(k5, (Dx,), jnp.float32) * 0.01
    params = (W1x, W1u, b1, W2, b2)

    # inputs: X state trajectory point (B, 1, Dx), U control (B, Du)
    X = jax.random.normal(k_x, (B, 1, Dx), jnp.float32)
    U = jax.random.normal(k_u, (B, Du), jnp.float32)

    fwd = jax.jit(residual_block_forward)
    out = jax.block_until_ready(fwd(X, U, params))

    ref = _reference_forward(X, U, params)
    assert out.shape == (B, 1, Dx)
    # bf16 matmuls (f32 accumulation / exact f32 residual) -> loosened tolerance
    assert jnp.allclose(out, ref, atol=5e-2, rtol=5e-2)

    print("KERNEL_OK")
</pallas_src>

<mosaic_0001>
module attributes {stable_mosaic.version = 11 : i64} {
  func.func @residual_block_kernel(%arg0: i32, %arg1: memref<32x128xf32, #tpu.memory_space<vmem>>, %arg2: memref<8x128xf32, #tpu.memory_space<vmem>>, %arg3: memref<64x32xbf16, #tpu.memory_space<vmem>>, %arg4: memref<64x8xbf16, #tpu.memory_space<vmem>>, %arg5: memref<64x1xf32, #tpu.memory_space<vmem>>, %arg6: memref<32x64xbf16, #tpu.memory_space<vmem>>, %arg7: memref<32x1xf32, #tpu.memory_space<vmem>>, %arg8: memref<32x128xf32, #tpu.memory_space<vmem>>) attributes {dimension_semantics = [#tpu.dimension_semantics<parallel>], iteration_bounds = array<i64: 4>, scalar_prefetch = 0 : i64, scratch_operands = 0 : i64, tpu.core_type = #tpu.core_type<tc>, window_params = [{transform_indices = @transform_0, window_bounds = array<i64: 32, 128>}, {transform_indices = @transform_1, window_bounds = array<i64: 8, 128>}, {pipeline_mode = #tpu.pipeline_mode<synchronous>, transform_indices = @transform_2, window_bounds = array<i64: 64, 32>}, {pipeline_mode = #tpu.pipeline_mode<synchronous>, transform_indices = @transform_3, window_bounds = array<i64: 64, 8>}, {pipeline_mode = #tpu.pipeline_mode<synchronous>, transform_indices = @transform_4, window_bounds = array<i64: 64, 1>}, {pipeline_mode = #tpu.pipeline_mode<synchronous>, transform_indices = @transform_5, window_bounds = array<i64: 32, 64>}, {pipeline_mode = #tpu.pipeline_mode<synchronous>, transform_indices = @transform_6, window_bounds = array<i64: 32, 1>}, {transform_indices = @transform_7, window_bounds = array<i64: 32, 128>}]} {
    %c0 = arith.constant 0 : index
    %c0_0 = arith.constant 0 : index
    %0 = vector.load %arg1[%c0, %c0_0] : memref<32x128xf32, #tpu.memory_space<vmem>>, vector<32x128xf32>
    %c0_1 = arith.constant 0 : index
    %c0_2 = arith.constant 0 : index
    %1 = vector.load %arg3[%c0_1, %c0_2] : memref<64x32xbf16, #tpu.memory_space<vmem>>, vector<64x32xbf16>
    %2 = arith.truncf %0 : vector<32x128xf32> to vector<32x128xbf16>
    %cst = arith.constant dense<0.000000e+00> : vector<64x128xf32>
    %3 = tpu.matmul %1, %2, %cst {dimension_numbers = #tpu.dot_dimension_numbers<[1], [0], [0], [1], [0, 0, 1, 1], [], []>} : vector<64x32xbf16>, vector<32x128xbf16>, vector<64x128xf32> -> vector<64x128xf32>
    %c0_3 = arith.constant 0 : index
    %c0_4 = arith.constant 0 : index
    %4 = vector.load %arg4[%c0_3, %c0_4] : memref<64x8xbf16, #tpu.memory_space<vmem>>, vector<64x8xbf16>
    %c0_5 = arith.constant 0 : index
    %c0_6 = arith.constant 0 : index
    %5 = vector.load %arg2[%c0_5, %c0_6] : memref<8x128xf32, #tpu.memory_space<vmem>>, vector<8x128xf32>
    %6 = arith.truncf %5 : vector<8x128xf32> to vector<8x128xbf16>
    %cst_7 = arith.constant dense<0.000000e+00> : vector<64x128xf32>
    %7 = tpu.matmul %4, %6, %cst_7 {dimension_numbers = #tpu.dot_dimension_numbers<[1], [0], [0], [1], [0, 0, 1, 1], [], []>} : vector<64x8xbf16>, vector<8x128xbf16>, vector<64x128xf32> -> vector<64x128xf32>
    %8 = arith.addf %3, %7 : vector<64x128xf32>
    %c0_8 = arith.constant 0 : index
    %c0_9 = arith.constant 0 : index
    %9 = vector.load %arg5[%c0_8, %c0_9] : memref<64x1xf32, #tpu.memory_space<vmem>>, vector<64x1xf32>
    %10 = vector.broadcast %9 : vector<64x1xf32> to vector<64x128xf32>
    %11 = arith.addf %8, %10 : vector<64x128xf32>
    %cst_10 = arith.constant 0.000000e+00 : f32
    %12 = vector.broadcast %cst_10 : f32 to vector<64x128xf32>
    %13 = arith.maximumf %11, %12 : vector<64x128xf32>
    %c0_11 = arith.constant 0 : index
    %c0_12 = arith.constant 0 : index
    %14 = vector.load %arg6[%c0_11, %c0_12] : memref<32x64xbf16, #tpu.memory_space<vmem>>, vector<32x64xbf16>
    %15 = arith.truncf %13 : vector<64x128xf32> to vector<64x128xbf16>
    %cst_13 = arith.constant dense<0.000000e+00> : vector<32x128xf32>
    %16 = tpu.matmul %14, %15, %cst_13 {dimension_numbers = #tpu.dot_dimension_numbers<[1], [0], [0], [1], [0, 0, 1, 1], [], []>} : vector<32x64xbf16>, vector<64x128xbf16>, vector<32x128xf32> -> vector<32x128xf32>
    %c0_14 = arith.constant 0 : index
    %c0_15 = arith.constant 0 : index
    %17 = vector.load %arg7[%c0_14, %c0_15] : memref<32x1xf32, #tpu.memory_space<vmem>>, vector<32x1xf32>
    %18 = vector.broadcast %17 : vector<32x1xf32> to vector<32x128xf32>
    %19 = arith.addf %16, %18 : vector<32x128xf32>
    %20 = arith.addf %19, %0 : vector<32x128xf32>
    %c0_16 = arith.constant 0 : index
    %c0_17 = arith.constant 0 : index
    %21 = vector.load %arg8[%c0_16, %c0_17] : memref<32x128xf32, #tpu.memory_space<vmem>>, vector<32x128xf32>
    tpu.vector_store %arg8[%c0_16, %c0_17], %20 {strides = array<i32>} : memref<32x128xf32, #tpu.memory_space<vmem>>, vector<32x128xf32>,
    return
  }
  func.func @transform_0(%arg0: i32) -> (i32, i32) {
    %c0_i32 = arith.constant 0 : i32
    %c0_i32_0 = arith.constant 0 : i32
    return %c0_i32, %arg0 : i32, i32
  }
  func.func @transform_1(%arg0: i32) -> (i32, i32) {
    %c0_i32 = arith.constant 0 : i32
    %c0_i32_0 = arith.constant 0 : i32
    return %c0_i32, %arg0 : i32, i32
  }
  func.func @transform_2(%arg0: i32) -> (i32, i32) {
    %c0_i32 = arith.constant 0 : i32
    %c0_i32_0 = arith.constant 0 : i32
    %c0_i32_1 = arith.constant 0 : i32
    return %c0_i32, %c0_i32_0 : i32, i32
  }
  func.func @transform_3(%arg0: i32) -> (i32, i32) {
    %c0_i32 = arith.constant 0 : i32
    %c0_i32_0 = arith.constant 0 : i32
    %c0_i32_1 = arith.constant 0 : i32
    return %c0_i32, %c0_i32_0 : i32, i32
  }
  func.func @transform_4(%arg0: i32) -> (i32, i32) {
    %c0_i32 = arith.constant 0 : i32
    %c0_i32_0 = arith.constant 0 : i32
    %c0_i32_1 = arith.constant 0 : i32
    return %c0_i32, %c0_i32_0 : i32, i32
  }
  func.func @transform_5(%arg0: i32) -> (i32, i32) {
    %c0_i32 = arith.constant 0 : i32
    %c0_i32_0 = arith.constant 0 : i32
    %c0_i32_1 = arith.constant 0 : i32
    return %c0_i32, %c0_i32_0 : i32, i32
  }
  func.func @transform_6(%arg0: i32) -> (i32, i32) {
    %c0_i32 = arith.constant 0 : i32
    %c0_i32_0 = arith.constant 0 : i32
    %c0_i32_1 = arith.constant 0 : i32
    return %c0_i32, %c0_i32_0 : i32, i32
  }
  func.func @transform_7(%arg0: i32) -> (i32, i32) {
    %c0_i32 = arith.constant 0 : i32
    %c0_i32_0 = arith.constant 0 : i32
    return %c0_i32, %arg0 : i32, i32
  }
}

</mosaic_0001>

<bundles_post_ra>
// kernel: residual_block_forward.1
= control target key start
LH: loop header
LB: loop body
LE: loop exit
PB: predicated region body
PF: predicated region fallthrough
CT: control target
= control target key end

     0   :  { %12 = vsyncpa [#allocation4], 0  ;;  %s1295_s0 = inlined_call_operand.vmem [shape: f32[32,512], index: 0, kind: input, shape index: {}]   ;;  %s1296_s1 = inlined_call_operand.vmem [shape: f32[8,512], index: 1, kind: input, shape index: {}]   ;;  %s1297_s2 = inlined_call_operand.vmem [shape: bf16[64,32], index: 2, kind: input, shape index: {}]   ;;  %s1298_s3 = inlined_call_operand.vmem [shape: bf16[64,8], index: 3, kind: input, shape index: {}]   ;;  %s1299_s4 = inlined_call_operand.vmem [shape: f32[64,1], index: 4, kind: input, shape index: {}]   ;;  %s1300_s5 = inlined_call_operand.vmem [shape: bf16[32,64], index: 5, kind: input, shape index: {}]   ;;  %s1301_s6 = inlined_call_operand.vmem [shape: f32[32,1], index: 6, kind: input, shape index: {}]   ;;  %s1302_s7 = inlined_call_operand.hbm [shape: f32[32,512], index: 7, kind: output, shape index: {}]  }
   0x1   :  { %14 = vsyncpa [#allocation4 + $0x1], 0  ;;  %s1085_s24 = smov 0   ;;  %s1087_s25 = smov 0  }
   0x2   :  { %s1089_s26 = smov 0   ;;  %s1091_s27 = smov 0  }
   0x3 LB: > { %s1106_s28 = sadd.s32 4294967295, %s1038_s27   ;;  %s828_s29 = sadd.s32 4294967294, %s1038_s27   ;;  %s1038_s27 = sphi %s1091_s27, %s1308_s27   ;;  %s1034_s26 = sphi %s1089_s26, %s1307_s26   ;;  %s1030_s25 = sphi %s1087_s25, %s1306_s25   ;;  %s1026_s24 = sphi %s1085_s24, %s1305_s24  }
   0x4   : > { %s1110_s30 = sadd.s32 1, %s1038_s27   ;;  %s27_s8 = sadd.s32 1, %s1034_s26 }
   0x5   : > { %s24_s9 = ssub.s32 %s1038_s27, %s1110_s30  ;;  %p34_p0 = scmp.ne.s32.totalorder %s1034_s26, %s1030_s25 }
   0x6   : > { %p25_p1 = scmp.eq.s32.totalorder %s24_s9, 0  ;;  %p35_p2 = scmp.eq.s32.totalorder %s1038_s27, 0 }
   0x7   : > { %p195_p3 = scmp.eq.s32.totalorder %s1106_s28, 3  ;;  %p200_p4 = scmp.ne.s32.totalorder %s1030_s25, %s1026_s24 }
   0x8   : > { %s1122_s10 = scalar_select %p25_p1, %s1034_s26, %s27_s8  }
   0x9   : > { %p36_p5 = por %p35_p2, %p34_p0  ;;  %p1124_p6 = por %p195_p3, %p34_p0 }
   0xa   : > { %p201_p7 = scmp.eq.s32.totalorder %s828_s29, 3  ;;  %p830_p9 = scmp.ge.s32.totalorder %s1038_s27, 4 }
   0xc   : > { %p1128_p8 = por %p201_p7, %p200_p4  ;;  %232 = sbr.rel (%p830_p9) target bundleno = 27 (0x1b), region = 36 }
  0x13   : > { %235 = sbr.rel (!%p36_p5) target bundleno = 27 (0x1b), region = 40  ;;  %s237_s13 = sand.u32 (%p36_p5), 1, %s1034_s26  }
  0x14   : > { %s832_s14 = sshll.u32 (%p36_p5), %s1038_s27, 3  ;;  %s831_s15 = sshll.u32 (%p36_p5), %s237_s13, 5 }
  0x15   : > { %s241_s18 = scalar_lea.vmem (%p36_p5), %s1295_s0, %s832_s14  ;;  %s239_s19 = scalar_lea.vmem (%p36_p5), [#allocation2], %s831_s15 }
  0x16   : > { %v275_v0 = vld [vmem:[%s241_s18] sm:$0xff] (%p36_p5) }
  0x17   : > { %v277_v1 = vld [vmem:[%s241_s18 + $0x20] sm:$0xff] (%p36_p5)  ;;  %276 = vst [vmem:[%s239_s19] sm:$0xff] (%p36_p5), %v275_v0 }
  0x18   : > { %v279_v2 = vld [vmem:[%s241_s18 + $0x40] sm:$0xff] (%p36_p5)  ;;  %278 = vst [vmem:[%s239_s19 + $0x8] sm:$0xff] (%p36_p5), %v277_v1 }
  0x19   : > { %280 = vst [vmem:[%s239_s19 + $0x10] sm:$0xff] (%p36_p5), %v279_v2  ;;  %v281_v3 = vld [vmem:[%s241_s18 + $0x60] sm:$0xff] (%p36_p5) }
  0x1a   : > { %282 = vst [vmem:[%s239_s19 + $0x18] sm:$0xff] %v281_v3 }
  0x1b PF: > { %p833_p10 = scmp.ge.s32.totalorder %s1038_s27, 1  ;;  %p294_p11 = scmp.lt.s32.totalorder %s1038_s27, 5 }
  0x1d   : > { %p295_p12 = pnand %p833_p10, %p294_p11 }
  0x1e   : > { %s301_s20 = sand.u32 (!%p295_p12), 1, %s1030_s25   ;;  %v966_v4 = vld [vmem:[%s1298_s3] sm:$0xff] (!%p295_p12)   ;;  %p336_p13 = scmp.lt.s32.totalorder (!%p295_p12), %s1106_s28, 3  ;;  %vm385_vm0 = vcmask (!%p295_p12), 64512   ;;  %vm487_vm1 = vcmask (!%p295_p12), 261120   ;;  %v1040_v10 = vmov (!%p295_p12), 0  }
  0x1f   : > { %298 = sbr.rel (%p295_p12) target bundleno = 523 (0x20b), region = 82  ;;  %s1146_s23 = sshll.u32 (!%p295_p12), %s301_s20, 5  ;;  %880 = vmatprep.mubr.msk.bf16.mxu1 (!%p295_p12), %vm385_vm0, %v966_v4  ;;  %964 = vset.pattern.permute.xlu0 (!%p295_p12), %v1040_v10  ;;  %v968_v12 = vld [vmem:[%s1297_s2] sm:$0xff] (!%p295_p12)   ;;  %vm398_vm2 = vcmask (!%p295_p12), 1043456   ;;  %v969_v15 = vld [vmem:[%s1297_s2 + $0x8] sm:$0xff] (!%p295_p12)   ;;  %v972_v17 = vld [vmem:[%s1297_s2 + $0x10] sm:$0xff] (!%p295_p12)  }
  0x20   : > { %s303_s29 = scalar_lea.vmem (!%p295_p12), [#allocation2], %s1146_s23  ;;  %965 = vset.pattern.permute.xlu1 (!%p295_p12), %v1040_v10  ;;  %892 = vmatprep.mubr.msk.bf16.mxu0 (!%p295_p12), %vm487_vm1, %v968_v12  ;;  %v565_v16 = vld [vmem:[%s1299_s4] sm:$0xff] (!%p295_p12)  ;;  %v567_v18 = vld [vmem:[%s1299_s4 + $0x10] sm:$0xff] (!%p295_p12)  ;;  %v967_v20 = vld [vmem:[%s1298_s3 + $0x8] sm:$0xff] (!%p295_p12)   ;;  %vm671_vm3 = vcmask (!%p295_p12), 523264   ;;  %s858_s9 = sshll.u32 (!%p295_p12), %s1106_s28, 7 }
  0x21   : > { %v1151_v5 = vld [vmem:[%s303_s29] sm:$0xff] (!%p295_p12)  ;;  %v1153_v6 = vld [vmem:[%s303_s29 + $0x8] sm:$0xff] (!%p295_p12)  ;;  %v1155_v7 = vld [vmem:[%s303_s29 + $0x10] sm:$0xff] (!%p295_p12)  ;;  %575 = vperm.xlu0 (!%p295_p12), %964, %v565_v16   ;;  %585 = vperm.xlu1 (!%p295_p12), %965, %v567_v18   ;;  %s1041_s16 = smov (!%p295_p12), [#allocation3]  }
  0x22   : > { %v353_v8 = vpack.c.bf16 (!%p295_p12), %v1153_v6, %v1151_v5  ;;  %v1159_v9 = vld [vmem:[%s303_s29 + $0x18] sm:$0xff] (!%p295_p12)  ;;  %v566_v21 = vld [vmem:[%s1299_s4 + $0x8] sm:$0xff] (!%p295_p12)  ;;  %v970_v22 = vld [vmem:[%s1298_s3 + $0x10] sm:$0xff] (!%p295_p12)   ;;  %s335_s29 = scalar_lea.vmem (!%p295_p12), [#allocation3], %s1146_s23 }
  0x23   : > { %v354_v11 = vpack.c.bf16 (!%p295_p12), %v1159_v9, %v1155_v7  ;;  %v568_v23 = vld [vmem:[%s1299_s4 + $0x18] sm:$0xff] (!%p295_p12)  ;;  %v569_v24 = vld [vmem:[%s1299_s4 + $0x20] sm:$0xff] (!%p295_p12)  ;;  %v570_v25 = vld [vmem:[%s1299_s4 + $0x28] sm:$0xff] (!%p295_p12) }
  0x24   : > { %888 = vmatprep.subr.bf16.mxu0 (!%p295_p12), %v353_v8  ;;  %v973_v26 = vld [vmem:[%s1297_s2 + $0x18] sm:$0xff] (!%p295_p12)   ;;  %v571_v28 = vld [vmem:[%s1299_s4 + $0x30] sm:$0xff] (!%p295_p12)  ;;  %v637_v30 = vld [vmem:[%s1301_s6] sm:$0xff] (!%p295_p12) }
  0x25   : > { %889 = vmatpush3.bf16.msra.mxu0 (!%p295_p12), %v353_v8  ;;  %580 = vperm.xlu0 (!%p295_p12), %964, %v566_v21   ;;  %v971_v27 = vld [vmem:[%s1298_s3 + $0x18] sm:$0xff] (!%p295_p12)   ;;  %v638_v31 = vld [vmem:[%s1301_s6 + $0x8] sm:$0xff] (!%p295_p12)  ;;  %v639_v32 = vld [vmem:[%s1301_s6 + $0x10] sm:$0xff] (!%p295_p12) }
  0x26   : > { %s337_s8 = scalar_select %p336_p13, %s1106_s28, 3  ;;  %890 = vmatprep.subr.bf16.mxu0 %v354_v11  ;;  %590 = vperm.xlu1 %965, %v568_v23   ;;  %v572_v29 = vld [vmem:[%s1299_s4 + $0x38] sm:$0xff]  ;;  %v974_v34 = vld [vmem:[%s1300_s5] sm:$0xff]  }
  0x27   : > { %v640_v33 = vld [vmem:[%s1301_s6 + $0x18] sm:$0xff]  ;;  %s1249_s28 = scalar_lea.hbm %s1302_s7, %s858_s9 }
  0x28   : > { %s836_s14 = sshll.u32 %s337_s8, 3  ;;  %s748_s8 = sshll.u32 %s335_s29, 4  ;;  %s1242_s8 = int_to_ptr.vmem [resolvable:$true] %s748_s8 }
  0x29   : > { %s339_s17 = scalar_lea.vmem %s1296_s1, %s836_s14  ;;  %891 = vmatpush3.bf16.msra.mxu0 %v354_v11  ;;  %595 = vperm.xlu0 %964, %v569_v24   ;;  %s1254_s14 = scalar_lea.sflag [#allocation4], %s301_s20 }
  0x2a   : > { %v363_v13 = vld [vmem:[%s339_s17] sm:$0xff]  ;;  %600 = vperm.xlu1 %965, %v570_v25   ;;  %s976_s15 = scalar_lea.vmem %s1242_s8, 512  ;;  %s980_s17 = sshll.u32 %s1041_s16, 4  ;;  %s981_s17 = int_to_ptr.vmem [resolvable:$false] %s980_s17 }
  0x2b   : > { %v364_v14 = vpack.c.bf16 %v363_v13, %v363_v13  ;;  %p977_p0 = scmp.ne.s32.totalorder %s1242_s8, %s976_s15  ;;  %s982_s18 = scalar_lea.vmem %s981_s17, 1024 }
  0x2c   : > { %893 = vmatmul.mubr.msk.bf16.vlgmr.msra.gmra.mrb[0].mxu0 %vm487_vm1, %v969_v15  ;;  %p983_p3 = scmp.lt.s32.totalorder %s1242_s8, %s981_s17  ;;  %p984_p4 = scmp.lt.s32.totalorder %s982_s18, %s976_s15 }
  0x2d   : > { %920 = vmatprep.subr.msk.bf16.mxu1 %vm398_vm2, %v364_v14  ;;  %v400_v19 = vsel %vm398_vm2, %v364_v14, 0  ;;  %896 = vmatprep.mubr.msk.bf16.mxu0 %vm487_vm1, %v972_v17  ;;  %p978_p1 = pnand %p977_p0, %p1124_p6 }
  0x2e   : > { %879 = vmatpush3.bf16.msra.mxu1 %v400_v19  ;;  %605 = vperm.xlu0 %964, %v571_v28   ;;  %p985_p5 = por %p984_p4, %p983_p3 }
  0x2f   : > { %610 = vperm.xlu1 %965, %v572_v29   ;;  %p979_p2 = pneg %p978_p1 }
  0x31   : > { %881 = vmatmul.mubr.msk.bf16.vlgmr.msra.gmra.mrb[0].mxu1 %vm385_vm0, %v967_v20  ;;  %p986_p7 = pnand %p985_p5, %p979_p2 }
  0x32   : > { %884 = vmatprep.mubr.msk.bf16.mxu1 %vm385_vm0, %v970_v22  ;;  %643 = vperm.xlu0 %964, %v637_v30  }
  0x33   : > { %648 = vperm.xlu1 %965, %v638_v31  }
  0x34   : > { %897 = vmatmul.mubr.msk.bf16.gmra.mrb[4].mxu0 %vm487_vm1, %v973_v26 }
  0x36   : > { %653 = vperm.xlu0 %964, %v639_v32  }
  0x37   : > { %658 = vperm.xlu1 %965, %v640_v33  }
  0x39   : > { %885 = vmatmul.mubr.msk.bf16.gmra.mrb[4].mxu1 %vm385_vm0, %v971_v27  ;;  %v975_v27 = vld [vmem:[%s1300_s5 + $0x8] sm:$0xff]  }
  0x3a   : > { %908 = vmatprep.mubr.msk.bf16.mxu1 %vm671_vm3, %v974_v34 }
  0xa0   : > { %v576_v35 = vpop.permute.xlu0 %575  ;;  %v586_v36 = vpop.permute.xlu1 %585 }
  0xa4   : > { %v581_v37 = vpop.permute.xlu0 %580 }
  0xa5   : > { %v591_v39 = vpop.permute.xlu1 %590 }
  0xa8   : > { %v596_v51 = vpop.permute.xlu0 %595 }
  0xa9   : > { %v601_v55 = vpop.permute.xlu1 %600 }
  0xad   : > { %v606_v8 = vpop.permute.xlu0 %605 }
  0xae   : > { %v611_v16 = vpop.permute.xlu1 %610 }
  0xb1   : > { %v644_v28 = vpop.permute.xlu0 %643 }
  0xb2   : > { %v649_v29 = vpop.permute.xlu1 %648 }
  0xb5   : > { %v654_v30 = vpop.permute.xlu0 %653 }
  0xb6   : > { %v659_v34 = vpop.permute.xlu1 %658 }
  0xff   : > { %v894_v38 = vpop.f32.mrb[0].mxu0 }
 0x100   : > { %v534_v40 = vpop.f32.mrb[1].mxu0 }
 0x101   : > { %v895_v42 = vpop.f32.mrb[2].mxu0 }
 0x102   : > { %v537_v45 = vpop.f32.mrb[3].mxu0 }
 0x104   : > { %v882_v41 = vpop.f32.mrb[0].mxu1 }
 0x105   : > { %v436_v43 = vpop.f32.mrb[1].mxu1  ;;  %v543_v44 = vadd.f32 %v894_v38, %v882_v41 }
 0x106   : > { %v883_v46 = vpop.f32.mrb[2].mxu1  ;;  %v535_v47 = vadd.f32 %v534_v40, %v436_v43 }
 0x107   : > { %v615_v48 = vadd.f32 %v586_v36, %v543_v44  ;;  %v439_v49 = vpop.f32.mrb[3].mxu1  ;;  %v546_v50 = vadd.f32 %v895_v42, %v883_v46  ;;  %v898_v57 = vpop.f32.mrb[4].mxu0 }
 0x108   : > { %v613_v52 = vadd.f32 %v576_v35, %v535_v47  ;;  %v538_v53 = vadd.f32 %v537_v45, %v439_v49  ;;  %v550_v60 = vpop.f32.mrb[5].mxu0 }
 0x109   : > { %v616_v54 = vadd.f32 %v591_v39, %v546_v50  ;;  %v623_v58 = vmax.f32 %v615_v48, 0.0  ;;  %v899_v0 = vpop.f32.mrb[6].mxu0 }
 0x10a   : > { %v614_v56 = vadd.f32 %v581_v37, %v538_v53  ;;  %v621_v61 = vmax.f32 %v613_v52, 0.0  ;;  %v553_v3 = vpop.f32.mrb[7].mxu0 }
 0x10b   : > { %v624_v59 = vmax.f32 %v616_v54, 0.0 }
 0x10c   : > { %v622_v62 = vmax.f32 %v614_v56, 0.0  ;;  %v886_v63 = vpop.f32.mrb[4].mxu1 }
 0x10d   : > { %v452_v1 = vpop.f32.mrb[5].mxu1  ;;  %v559_v2 = vadd.f32 %v898_v57, %v886_v63  ;;  %v634_v4 = vpack.c.bf16 %v624_v59, %v623_v58 }
 0x10e   : > { %v887_v10 = vpop.f32.mrb[6].mxu1  ;;  %v551_v11 = vadd.f32 %v550_v60, %v452_v1  ;;  %v633_v12 = vpack.c.bf16 %v622_v62, %v621_v61 }
 0x10f   : > { %v619_v13 = vadd.f32 %v606_v8, %v559_v2  ;;  %v455_v14 = vpop.f32.mrb[7].mxu1  ;;  %v562_v15 = vadd.f32 %v899_v0, %v887_v10 }
 0x110   : > { %v617_v17 = vadd.f32 %v596_v51, %v551_v11  ;;  %v554_v18 = vadd.f32 %v553_v3, %v455_v14  ;;  %900 = vmatprep.subr.bf16.mxu1 %v633_v12 }
 0x111   : > { %v620_v19 = vadd.f32 %v611_v16, %v562_v15  ;;  %901 = vmatpush3.bf16.msra.mxu1 %v633_v12  ;;  %v627_v21 = vmax.f32 %v619_v13, 0.0 }
 0x112   : > { %v618_v20 = vadd.f32 %v601_v55, %v554_v18  ;;  %902 = vmatprep.subr.bf16.mxu1 %v634_v4  ;;  %v625_v23 = vmax.f32 %v617_v17, 0.0 }
 0x113   : > { %v628_v22 = vmax.f32 %v620_v19, 0.0 }
 0x114   : > { %v626_v24 = vmax.f32 %v618_v20, 0.0 }
 0x115   : > { %903 = vmatpush3.bf16.msra.mxu1 %v634_v4  ;;  %v636_v25 = vpack.c.bf16 %v628_v22, %v627_v21 }
 0x116   : > { %v635_v26 = vpack.c.bf16 %v626_v24, %v625_v23 }
 0x118   : > { %904 = vmatprep.subr.bf16.mxu1 %v635_v26 }
 0x119   : > { %905 = vmatpush3.bf16.msra.mxu1 %v635_v26 }
 0x11a   : > { %906 = vmatprep.subr.bf16.mxu1 %v636_v25 }
 0x11d   : > { %907 = vmatpush3.bf16.msra.mxu1 %v636_v25 }
 0x120   : > { %909 = vmatmul.mubr.msk.bf16.vlgmr.msra.gmra.mrb[8].mxu1 %vm671_vm3, %v975_v27 }
 0x1f3   : > { %v910_v31 = vpop.f32.mrb[8].mxu1 }
 0x1f4   : > { %v721_v32 = vadd.f32 %v910_v31, %v654_v30  ;;  %v712_v33 = vpop.f32.mrb[9].mxu1 }
 0x1f5   : > { %v713_v35 = vadd.f32 %v712_v33, %v644_v28  ;;  %v911_v36 = vpop.f32.mrb[10].mxu1 }
 0x1f6   : > { %v729_v37 = vadd.f32 %v721_v32, %v1155_v7  ;;  %v724_v38 = vadd.f32 %v911_v36, %v659_v34  ;;  %v715_v39 = vpop.f32.mrb[11].mxu1 }
 0x1f7   : > { %v727_v40 = vadd.f32 %v713_v35, %v1151_v5  ;;  %v716_v41 = vadd.f32 %v715_v39, %v649_v29 }
 0x1f8   : > { %733 = vst [vmem:[%s335_s29 + $0x10] sm:$0xff] %v729_v37  ;;  %v730_v42 = vadd.f32 %v724_v38, %v1159_v9 }
 0x1f9   : > { %731 = vst [vmem:[%s335_s29] sm:$0xff] %v727_v40  ;;  %v728_v7 = vadd.f32 %v716_v41, %v1153_v6 }
 0x1fa   : > { %734 = vst [vmem:[%s335_s29 + $0x18] sm:$0xff] %v730_v42 }
 0x1fb   : > { %732 = vst [vmem:[%s335_s29 + $0x8] sm:$0xff] %v728_v7 }
 0x1fc   : > { %989 = shalt.err (!%p986_p7)
}
 0x1fd   : > { %s990_s20 = scalar_lea.hbm %s1249_s28, 512  ;;  %s994_s22 = scalar_lea.hbm %s1302_s7, 2048 }
 0x1fe   : > { %p991_p9 = scmp.ne.s32.totalorder %s1249_s28, %s990_s20  ;;  %p995_p12 = scmp.lt.u32.totalorder %s1249_s28, %s1302_s7 }
 0x1ff   : > { %p996_p13 = scmp.lt.u32.totalorder %s994_s22, %s990_s20  ;;  %p998_p1 = scmp.lt.u32.totalorder %s990_s20, %s1249_s28 }
 0x200   : > { %p992_p10 = pnand %p991_p9, %p1124_p6 }
 0x201   : > { %p997_p0 = por %p996_p13, %p995_p12 }
 0x202   : > { %p993_p11 = pneg %p992_p10 }
 0x203   : > { %p999_p2 = por %p998_p1, %p997_p0 }
 0x205   : > { %p1000_p3 = pnand %p999_p2, %p993_p11 }
 0x207   : > { %1003 = shalt.err (!%p1000_p3)
}
 0x208   : > { %s1042_s23 = smov 128   ;;  %s1043_s13 = smov 512  }
 0x209   : > { %s1044_s15 = smov 8  }
 0x20a   : > { %921 = dma.vmem_to_hbm [thread:$0]  (%p1124_p6), %s1242_s8, 512, %s1249_s28, %s1254_s14, %s1042_s23, %s1043_s13, %s1044_s15  }
 0x20b PF: > { %p927_p4 = scmp.ge.s32.totalorder %s1038_s27, 2  ;;  %s763_s16 = sand.u32 1, %s1026_s24  }
 0x20c   : > { %s764_s17 = scalar_lea.sflag [#allocation4], %s763_s16 }
 0x20d   : > { %p924_p5 = pnand %p927_p4, %p1128_p8 }
 0x20f   : > { %1021 = dma.done.wait (!%p924_p5), %s764_s17, 512  }
 0x210   : > { %1023 = vsyncadd (!%p924_p5), %s764_s17, 4294966784  ;;  %p17_p7 = scmp.ge.s32.totalorder %s1110_s30, 6   ;;  %s1305_s24 = smov %s1030_s25 }
 0x211   : > { %s1306_s25 = smov %s1034_s26  ;;  %s1307_s26 = smov %s1122_s10 }
 0x212   : > { %s1308_s27 = smov %s1110_s30  ;;  %19 = sbr.rel (!%p17_p7) target bundleno = 3 (0x3), region = 129 }
 0x219   :  { %769 = vsyncpa [#allocation4], 1 }
 0x21a   :  { %771 = vsyncpa [#allocation4 + $0x1], 1 }

</bundles_post_ra>
